<compile_context>
chip_gen: v7x
topology: tpu7x:2x2x1
jax: 0.10.0
libtpu: 0.0.40
codegen_flags: <defaults>
</compile_context>

<pallas_src>
import functools

import numpy as np
import jax
import jax.numpy as jnp
from jax.experimental import pallas as pl
from jax.experimental.pallas import tpu as pltpu


def _round_up(n, m):
    return ((n + m - 1) // m) * m


def _host_constants(q_len, d_model, exp, norm, eps):
    """Replicates the module __init__ on host.

    Returns (p_scaled, q, b): 1-D powered linspaces with the normalization
    scale folded into p, and the additive shift b, so that
        cpe_normalized = p_scaled[:, None] * q[None, :] + b.
    """
    # TODO(synk): the data-dependent 200-iteration exponent search is init-time
    # parameter setup (not forward compute); it stays on host in NumPy.  A
    # borderline float32 mean vs eps could flip the break iteration relative to
    # torch and shift x by +/-0.001 (discrete divergence, not just rounding).
    x = 0.5 if exp else 1.0
    lq = np.linspace(0.0, 1.0, q_len, dtype=np.float32).reshape(-1, 1)
    ld = np.linspace(0.0, 1.0, d_model, dtype=np.float32).reshape(1, -1)
    x_used = x
    cpe = None
    for _ in range(200):
        x_used = x
        cpe = 2.0 * (lq ** x) * (ld ** x) - 1.0  # float32, same op order as torch
        m = float(cpe.mean())
        if abs(m) <= eps:
            break
        elif m > eps:
            x += 0.001
        else:
            x -= 0.001

    p32 = (lq ** x_used).reshape(-1)   # t^x, float32 — exact factors of cpe
    q32 = (ld ** x_used).reshape(-1)   # f^x, float32

    if norm:
        n = cpe.size
        assert n > 1, "normalization needs q_len * d_model > 1"
        cpe64 = cpe.astype(np.float64)
        mean = float(cpe64.mean())
        var = float(((cpe64 - mean) ** 2).sum() / (n - 1))  # ddof=1, torch.std()
        inv = 1.0 / (np.sqrt(var) * 10.0)
        a = 2.0 * inv
        b = -(1.0 + mean) * inv
    else:
        a = 2.0
        b = -1.0

    p_scaled = (a * p32.astype(np.float64)).astype(np.float32)
    return p_scaled, q32, float(b)


@functools.lru_cache(maxsize=None)
def _build_cpe(q_len, d_model, exp=False, norm=True, eps=1e-3,
               out_dtype=jnp.float32):
    """Builds the constant positional embedding (1, q_len, d_model) once and
    caches it — the result is a deterministic function of the static config."""
    p, q, b = _host_constants(q_len, d_model, exp, norm, eps)

    # ---- Tile sizing: store-bound kernel, so size by VMEM bytes only. ----
    # Per pipeline-buffer set (everything is double-buffered by BlockSpec):
    #   out tile : tq * d_lanes * itemsize       (features padded to 128 lanes)
    #   p column : tq * 128 * 4                  ((tq,1) f32 block lane-pads to 128)
    #   q row    : 8 * d_lanes * 4               ((1,d) f32 block sublane-pads to 8)
    # Budget 6 MiB/set -> ~12 MiB double-buffered: under v5e's 16 MiB scoped
    # default (v6e/v7x: 32 MiB), and large enough to amortize the ~0.35 us
    # per-grid-step overhead even against v7x's 3.2 TB/s HBM.
    itemsize = int(np.dtype(out_dtype).itemsize)
    row_align = 8 * max(1, 4 // itemsize)        # 8 for f32, 16 for bf16
    d_lanes = _round_up(d_model, 128)
    q_pad = _round_up(q_len, row_align)

    budget = 6 * 1024 * 1024
    per_row_bytes = d_lanes * itemsize + 128 * 4
    fixed_bytes = 8 * d_lanes * 4
    tq = ((budget - fixed_bytes) // per_row_bytes) // row_align * row_align
    tq = max(row_align, tq)
    tq = min(tq, q_pad)

    grid = pl.cdiv(q_len, tq)
    p_rows = grid * tq                            # full input blocks; the final
    #                                               output block is clipped.

    p_dev = jnp.zeros((p_rows, 1), jnp.float32).at[:q_len, 0].set(jnp.asarray(p))
    q_dev = jnp.asarray(q, jnp.float32).reshape(1, d_model)
    bias = np.float32(b)

    def kernel(p_ref, q_ref, out_ref):
        # Single-pass broadcast FMA per vreg; purely HBM-writeback bound.
        out_ref[...] = (p_ref[...] * q_ref[...] + bias).astype(out_ref.dtype)

    # TODO(synk): on v7x, pltpu.CORE_PARALLEL on the row axis would shard the
    # row tiles across the two TensorCores; kept "parallel" here (a no-op on
    # single-TC v5e/v6e) for compile portability across generations.
    out = pl.pallas_call(
        kernel,
        out_shape=jax.ShapeDtypeStruct((1, q_len, d_model), out_dtype),
        grid=(grid,),
        in_specs=[
            pl.BlockSpec((tq, 1), lambda i: (i, 0)),        # scaled t^x column
            pl.BlockSpec((1, d_model), lambda i: (0, 0)),   # f^x row (full width)
        ],
        # Leading batch dim squeezed; last block dim equals full d_model so the
        # (8,128) rule is satisfied even for ragged feature widths.  The final
        # row block is clipped by Pallas when q_len % tq != 0.
        out_specs=pl.BlockSpec((None, tq, d_model), lambda i: (0, i, 0)),
        compiler_params=pltpu.CompilerParams(
            dimension_semantics=("parallel",),
        ),
    )(p_dev, q_dev)

    return out


def coor2d_linear_pos_embedding(x, q_len, d_model, exp=False, norm=True,
                                eps=1e-3, out_dtype=jnp.float32):
    """Forward pass: returns the constant embedding of shape (1, q_len, d_model)."""
    del x  # only used for device placement in the reference PyTorch module
    return _build_cpe(q_len, d_model, exp=exp, norm=norm, eps=eps,
                      out_dtype=out_dtype)


def _reference(q_len, d_model, exp=False, norm=True, eps=1e-3):
    """Pure-NumPy transcription of the PyTorch module."""
    x = 0.5 if exp else 1.0
    lq = np.linspace(0.0, 1.0, q_len, dtype=np.float32).reshape(-1, 1)
    ld = np.linspace(0.0, 1.0, d_model, dtype=np.float32).reshape(1, -1)
    cpe = None
    for _ in range(200):
        cpe = 2.0 * (lq ** x) * (ld ** x) - 1.0
        m = float(cpe.mean())
        if abs(m) <= eps:
            break
        elif m > eps:
            x += 0.001
        else:
            x -= 0.001
    if norm:
        cpe = cpe - cpe.mean()
        cpe = cpe / (cpe.std(ddof=1) * 10.0)
    return cpe[None].astype(np.float32)


if __name__ == "__main__":
    batch, q_len, d_model = 2, 8, 32
    key = jax.random.PRNGKey(0)
    x = jax.random.normal(key, (batch, q_len, d_model), dtype=jnp.float32)

    out = coor2d_linear_pos_embedding(x, q_len=q_len, d_model=d_model)
    out = jax.block_until_ready(out)
    assert out.shape == (1, q_len, d_model), out.shape
    np.testing.assert_allclose(
        np.asarray(out), _reference(q_len, d_model), rtol=1e-4, atol=2e-5
    )

    # Exercises a ragged feature axis (masked lane-tail stores) with q_len a
    # multiple of 8.
    q2, d2 = 24, 160
    out2 = coor2d_linear_pos_embedding(x, q_len=q2, d_model=d2)
    out2 = jax.block_until_ready(out2)
    assert out2.shape == (1, q2, d2), out2.shape
    np.testing.assert_allclose(
        np.asarray(out2), _reference(q2, d2), rtol=1e-4, atol=2e-5
    )

    # Exercises a clipped final row block (q_len % 8 != 0) and a feature axis
    # narrower than one lane group.
    q3, d3 = 30, 96
    out3 = coor2d_linear_pos_embedding(x, q_len=q3, d_model=d3)
    out3 = jax.block_until_ready(out3)
    assert out3.shape == (1, q3, d3), out3.shape
    np.testing.assert_allclose(
        np.asarray(out3), _reference(q3, d3), rtol=1e-4, atol=2e-5
    )

    print("KERNEL_OK")
</pallas_src>

<mosaic_0001>
module attributes {stable_mosaic.version = 11 : i64} {
  func.func @kernel(%arg0: i32, %arg1: memref<8x1xf32, #tpu.memory_space<vmem>>, %arg2: memref<1x32xf32, #tpu.memory_space<vmem>>, %arg3: memref<1x8x32xf32, #tpu.memory_space<vmem>>) attributes {dimension_semantics = [#tpu.dimension_semantics<parallel>], iteration_bounds = array<i64: 1>, scalar_prefetch = 0 : i64, scratch_operands = 0 : i64, tpu.core_type = #tpu.core_type<tc>, window_params = [{transform_indices = @transform_0, window_bounds = array<i64: 8, 1>}, {pipeline_mode = #tpu.pipeline_mode<synchronous>, transform_indices = @transform_1, window_bounds = array<i64: 1, 32>}, {transform_indices = @transform_2, window_bounds = array<i64: 1, 8, 32>}]} {
    %c0 = arith.constant 0 : index
    %c0_0 = arith.constant 0 : index
    %0 = vector.load %arg1[%c0, %c0_0] : memref<8x1xf32, #tpu.memory_space<vmem>>, vector<8x1xf32>
    %c0_1 = arith.constant 0 : index
    %c0_2 = arith.constant 0 : index
    %1 = vector.load %arg2[%c0_1, %c0_2] : memref<1x32xf32, #tpu.memory_space<vmem>>, vector<1x32xf32>
    %2 = vector.broadcast %0 : vector<8x1xf32> to vector<8x32xf32>
    %3 = vector.broadcast %1 : vector<1x32xf32> to vector<8x32xf32>
    %4 = arith.mulf %2, %3 : vector<8x32xf32>
    %cst = arith.constant -0.119033851 : f32
    %5 = vector.broadcast %cst : f32 to vector<8x32xf32>
    %6 = arith.addf %4, %5 : vector<8x32xf32>
    %c0_3 = arith.constant 0 : index
    %c0_4 = arith.constant 0 : index
    %c0_5 = arith.constant 0 : index
    %7 = vector.load %arg3[%c0_3, %c0_4, %c0_5] : memref<1x8x32xf32, #tpu.memory_space<vmem>>, vector<1x8x32xf32>
    %8 = vector.shape_cast %7 : vector<1x8x32xf32> to vector<8x32xf32>
    %9 = vector.shape_cast %6 : vector<8x32xf32> to vector<1x8x32xf32>
    tpu.vector_store %arg3[%c0_3, %c0_4, %c0_5], %9 {strides = array<i32>} : memref<1x8x32xf32, #tpu.memory_space<vmem>>, vector<1x8x32xf32>,
    return
  }
  func.func @transform_0(%arg0: i32) -> (i32, i32) {
    %c0_i32 = arith.constant 0 : i32
    %c0_i32_0 = arith.constant 0 : i32
    return %arg0, %c0_i32 : i32, i32
  }
  func.func @transform_1(%arg0: i32) -> (i32, i32) {
    %c0_i32 = arith.constant 0 : i32
    %c0_i32_0 = arith.constant 0 : i32
    %c0_i32_1 = arith.constant 0 : i32
    return %c0_i32, %c0_i32_0 : i32, i32
  }
  func.func @transform_2(%arg0: i32) -> (i32, i32, i32) {
    %c0_i32 = arith.constant 0 : i32
    %c0_i32_0 = arith.constant 0 : i32
    %c0_i32_1 = arith.constant 0 : i32
    return %c0_i32, %arg0, %c0_i32_0 : i32, i32, i32
  }
}

</mosaic_0001>

<bundles_post_ra>
// kernel: tpu_custom_call.1
= control target key start
LH: loop header
LB: loop body
LE: loop exit
PB: predicated region body
PF: predicated region fallthrough
CT: control target
= control target key end

     0   :  { %s106_s0 = inlined_call_operand.vmem [shape: f32[8,1], index: 0, kind: input, shape index: {}]   ;;  %s107_s1 = inlined_call_operand.vmem [shape: f32[1,32], index: 1, kind: input, shape index: {}]   ;;  %s108_s2 = inlined_call_operand.hbm [shape: f32[1,8,32], index: 2, kind: output, shape index: {}]  }
   0x1   :  { %v12_v0 = vld [vmem:[%s106_s0] sm:$0xff] }
   0x2   :  { %7 = vsyncpa [#allocation3], 0  ;;  %v71_v1 = vmov 0   ;;  %v43_v2 = vld [vmem:[%s107_s1] ss:$0 sm:$0xff]  ;;  %s72_s13 = smov [#allocation2]  }
   0x3   :  { %46 = vset.pattern.permute.xlu0 %v71_v1  ;;  %s35_s14 = sshll.u32 %s72_s13, 4  ;;  %vm27_vm0 = vcmask 261120   ;;  %s36_s14 = int_to_ptr.vmem [resolvable:$true] %s35_s14 }
   0x4   :  { %16 = vperm.xlu0 %46, %v12_v0   ;;  %s47_s15 = scalar_lea.vmem %s36_s14, 128  ;;  %p52_p1 = scmp.lt.s32.totalorder %s36_s14, %s36_s14 }
   0x5   :  { %p48_p0 = scmp.ne.s32.totalorder %s36_s14, %s47_s15  ;;  %p53_p2 = scmp.lt.s32.totalorder %s47_s15, %s47_s15 }
   0x7   :  { %p54_p3 = por %p53_p2, %p52_p1 }
   0x9   :  { %p55_p4 = pnand %p54_p3, %p48_p0 }
  0x83   :  { %v17_v3 = vpop.permute.xlu0 %16 }
  0x84   :  { %v25_v4 = vmul.f32 %v43_v2, %v17_v3 }
  0x86   :  { %v26_v5 = vadd.f32 -0.11903385, %v25_v4 }
  0x88   :  { %28 = vst.msk [vmem:[#allocation2] sm:$0xff] %vm27_vm0, %v26_v5 }
  0x89   :  { %58 = shalt.err (!%p55_p4)
}
  0x8a   :  { %s59_s17 = scalar_lea.hbm %s108_s2, 128 }
  0x8b   :  { %p60_p5 = scmp.ne.s32.totalorder %s108_s2, %s59_s17  ;;  %p63_p6 = scmp.lt.u32.totalorder %s59_s17, %s108_s2 }
  0x8d   :  { %p65_p7 = pnand %p63_p6, %p60_p5 }
  0x8f   :  { %68 = shalt.err (!%p65_p7)
}
  0x90   :  { %38 = dma.vmem_to_hbm [thread:$0]  %s36_s14, 128, %s108_s2, [#allocation3]  }
  0x91   :  { %69 = dma.done.wait [#allocation3], 128  }
  0x92   :  { %70 = vsyncadd [#allocation3], 4294967168 }
  0x93   :  { %42 = vsyncpa [#allocation3], 1 }

</bundles_post_ra>
